<compile_context>
chip_gen: v7x
topology: tpu7x:2x2x1
jax: 0.10.0
libtpu: 0.0.40
codegen_flags: <defaults>
</compile_context>

<pallas_src>
import jax
import jax.numpy as jnp
from jax.experimental import pallas as pl
from jax.experimental.pallas import tpu as pltpu


# Hidden sizes (fixed by the module defaults).
H0, H1, H2 = 256, 128, 64

# Lane layout of the fused (B, 128) output slab.
GEAR_LANES = (0, 7)      # 7 gear logits
BRAKE_LANES = (7, 9)     # 2 brake logits
ACCEL_LANE = 9           # sigmoid
STEER_LANE = 10          # tanh
HEAD_DIM = 11            # real head columns
OUT_LANES = 128          # lane-dense padded output width

# Packed-bias lane offsets (each a multiple of 128).
B1_OFF = 0               # width H0 = 256
B2_OFF = 256             # width H1 = 128
B3_OFF = 384             # width H2 = 64 (region padded to 128)
BH_OFF = 512             # width OUT_LANES = 128
BIAS_LANES = 640


def torcs_mlp_kernel(x_ref, w1_ref, w2_ref, w3_ref, wh_ref, bias_ref, out_ref):
    # Static lane-slices of the single packed bias buffer (free views).
    b1 = bias_ref[:, B1_OFF:B1_OFF + H0]
    b2 = bias_ref[:, B2_OFF:B2_OFF + H1]
    b3 = bias_ref[:, B3_OFF:B3_OFF + H2]
    bh = bias_ref[:, BH_OFF:BH_OFF + OUT_LANES]

    # Backbone: (Linear -> ReLU -> BatchNorm -> Dropout) x3.
    # BN affine pre-folded into the following Linear; Dropout = identity (eval).
    # bf16 at the MXU operands only; f32 accumulate / elementwise.
    h = x_ref[...].astype(jnp.bfloat16)
    h = jnp.maximum(
        jnp.dot(h, w1_ref[...], preferred_element_type=jnp.float32) + b1, 0.0)
    h = jnp.maximum(
        jnp.dot(h.astype(jnp.bfloat16), w2_ref[...],
                preferred_element_type=jnp.float32) + b2, 0.0)
    h = jnp.maximum(
        jnp.dot(h.astype(jnp.bfloat16), w3_ref[...],
                preferred_element_type=jnp.float32) + b3, 0.0)

    # Single fused head matmul: 11 real output columns zero-padded to 128 lanes.
    raw = jnp.dot(h.astype(jnp.bfloat16), wh_ref[...],
                  preferred_element_type=jnp.float32) + bh

    # Exact sigmoid / tanh over the (B, 128) vreg; select per lane.
    lane = jax.lax.broadcasted_iota(jnp.int32, raw.shape, 1)
    sig = jax.nn.sigmoid(raw)
    tnh = jnp.tanh(raw)
    out_ref[...] = jnp.where(lane == ACCEL_LANE, sig,
                             jnp.where(lane == STEER_LANE, tnh, raw))


def torcs_mlp_forward(x, kp):
    """x: (B, input_size) f32.  kp: folded kernel params (see fold_params)."""
    B = x.shape[0]
    args = (x, kp["w1"], kp["w2"], kp["w3"], kp["wh"], kp["bias"])
    vmem = pl.BlockSpec(memory_space=pltpu.MemorySpace.VMEM)
    out = pl.pallas_call(
        torcs_mlp_kernel,
        out_shape=jax.ShapeDtypeStruct((B, OUT_LANES), jnp.float32),
        in_specs=[vmem] * len(args),
        out_specs=vmem,
    )(*args)
    gear = out[:, GEAR_LANES[0]:GEAR_LANES[1]]
    brake = out[:, BRAKE_LANES[0]:BRAKE_LANES[1]]
    accel = out[:, ACCEL_LANE:ACCEL_LANE + 1]
    steer = out[:, STEER_LANE:STEER_LANE + 1]
    return gear, brake, accel, steer


def make_params(key, input_size, eps=1e-5):
    """Deterministic synthetic parameters (shapes match the PyTorch module).
    Linear weights are stored (in_features, out_features) = W.T of nn.Linear."""
    ks = iter(jax.random.split(key, 32))

    def linear(in_f, out_f):
        w = jax.random.normal(next(ks), (in_f, out_f), jnp.float32) * 0.05
        b = jax.random.normal(next(ks), (1, out_f), jnp.float32) * 0.01
        return w, b

    def bn_affine(f):
        gamma = 1.0 + 0.1 * jax.random.normal(next(ks), (1, f), jnp.float32)
        beta = 0.05 * jax.random.normal(next(ks), (1, f), jnp.float32)
        run_mean = 0.1 * jax.random.normal(next(ks), (1, f), jnp.float32)
        run_var = jnp.abs(1.0 + 0.1 * jax.random.normal(next(ks), (1, f), jnp.float32))
        scale = gamma / jnp.sqrt(run_var + eps)       # eval-mode BN -> affine
        shift = beta - run_mean * scale
        return scale, shift

    p = {}
    p["w1"], p["b1"] = linear(input_size, H0)
    p["s1"], p["t1"] = bn_affine(H0)
    p["w2"], p["b2"] = linear(H0, H1)
    p["s2"], p["t2"] = bn_affine(H1)
    p["w3"], p["b3"] = linear(H1, H2)
    p["s3"], p["t3"] = bn_affine(H2)
    p["wg"], p["bg"] = linear(H2, 7)
    p["wb"], p["bb"] = linear(H2, 2)
    p["wa"], p["ba"] = linear(H2, 1)
    p["ws"], p["bs"] = linear(H2, 1)
    return p


def fold_params(p):
    """Fold BN affines into the following Linear (exact, done in f32), fuse +
    lane-pad the four heads, pack the biases, then cast weights to bf16."""
    w1 = p["w1"]
    b1 = p["b1"]
    w2 = p["w2"] * p["s1"].reshape(-1, 1)
    b2 = p["t1"] @ p["w2"] + p["b2"]
    w3 = p["w3"] * p["s2"].reshape(-1, 1)
    b3 = p["t2"] @ p["w3"] + p["b3"]

    wh = jnp.concatenate([p["wg"], p["wb"], p["wa"], p["ws"]], axis=1)   # (H2, 11)
    bh = jnp.concatenate([p["bg"], p["bb"], p["ba"], p["bs"]], axis=1)   # (1, 11)
    whf = wh * p["s3"].reshape(-1, 1)
    bhf = p["t3"] @ wh + bh
    wh_pad = jnp.zeros((H2, OUT_LANES), jnp.float32).at[:, :HEAD_DIM].set(whf)
    bh_pad = jnp.zeros((1, OUT_LANES), jnp.float32).at[:, :HEAD_DIM].set(bhf)

    bias = jnp.zeros((1, BIAS_LANES), jnp.float32)
    bias = bias.at[:, B1_OFF:B1_OFF + H0].set(b1)
    bias = bias.at[:, B2_OFF:B2_OFF + H1].set(b2)
    bias = bias.at[:, B3_OFF:B3_OFF + H2].set(b3)
    bias = bias.at[:, BH_OFF:BH_OFF + OUT_LANES].set(bh_pad)

    return {
        "w1": w1.astype(jnp.bfloat16),
        "w2": w2.astype(jnp.bfloat16),
        "w3": w3.astype(jnp.bfloat16),
        "wh": wh_pad.astype(jnp.bfloat16),
        "bias": bias,                       # f32 packed biases
    }


def reference_forward(x, p):
    """Pure-JAX f32 reference with the module's exact eval semantics (unfused).
    Order per nn.Sequential: Linear -> ReLU -> BatchNorm1d -> Dropout(eval)."""
    def block(h, w, b, s, t):
        return jnp.maximum(h @ w + b, 0.0) * s + t
    h = block(x, p["w1"], p["b1"], p["s1"], p["t1"])
    h = block(h, p["w2"], p["b2"], p["s2"], p["t2"])
    h = block(h, p["w3"], p["b3"], p["s3"], p["t3"])
    gear = h @ p["wg"] + p["bg"]
    brake = h @ p["wb"] + p["bb"]
    accel = jax.nn.sigmoid(h @ p["wa"] + p["ba"])
    steer = jnp.tanh(h @ p["ws"] + p["bs"])
    return gear, brake, accel, steer


if __name__ == "__main__":
    key = jax.random.PRNGKey(0)
    kx, kparams = jax.random.split(key)

    batch = 8
    input_size = 32

    x = jax.random.normal(kx, (batch, input_size), jnp.float32)
    params = make_params(kparams, input_size)
    kernel_params = fold_params(params)

    outs = torcs_mlp_forward(x, kernel_params)
    outs = jax.block_until_ready(outs)

    refs = reference_forward(x, params)
    # bf16 matmul operands -> relaxed tolerance vs the f32 reference.
    for o, r in zip(outs, refs):
        assert o.shape == r.shape and o.dtype == r.dtype
        assert jnp.allclose(o, r, atol=2e-2, rtol=2e-2), "mismatch vs reference"

    print("KERNEL_OK")
</pallas_src>

<mosaic_0001>
module attributes {stable_mosaic.version = 11 : i64} {
  func.func @torcs_mlp_kernel(%arg0: memref<8x32xf32, #tpu.memory_space<vmem>>, %arg1: memref<32x256xbf16, #tpu.memory_space<vmem>>, %arg2: memref<256x128xbf16, #tpu.memory_space<vmem>>, %arg3: memref<128x64xbf16, #tpu.memory_space<vmem>>, %arg4: memref<64x128xbf16, #tpu.memory_space<vmem>>, %arg5: memref<1x640xf32, #tpu.memory_space<vmem>>, %arg6: memref<8x128xf32, #tpu.memory_space<vmem>>) attributes {dimension_semantics = [], scalar_prefetch = 0 : i64, scratch_operands = 0 : i64, tpu.core_type = #tpu.core_type<tc>} {
    %c0 = arith.constant 0 : index
    %c0_0 = arith.constant 0 : index
    %0 = vector.load %arg5[%c0, %c0_0] : memref<1x640xf32, #tpu.memory_space<vmem>>, vector<1x256xf32>
    %c0_1 = arith.constant 0 : index
    %c256 = arith.constant 256 : index
    %1 = vector.load %arg5[%c0_1, %c256] : memref<1x640xf32, #tpu.memory_space<vmem>>, vector<1x128xf32>
    %c0_2 = arith.constant 0 : index
    %c384 = arith.constant 384 : index
    %2 = vector.load %arg5[%c0_2, %c384] : memref<1x640xf32, #tpu.memory_space<vmem>>, vector<1x64xf32>
    %c0_3 = arith.constant 0 : index
    %c512 = arith.constant 512 : index
    %3 = vector.load %arg5[%c0_3, %c512] : memref<1x640xf32, #tpu.memory_space<vmem>>, vector<1x128xf32>
    %c0_4 = arith.constant 0 : index
    %c0_5 = arith.constant 0 : index
    %4 = vector.load %arg0[%c0_4, %c0_5] : memref<8x32xf32, #tpu.memory_space<vmem>>, vector<8x32xf32>
    %5 = arith.truncf %4 : vector<8x32xf32> to vector<8x32xbf16>
    %c0_6 = arith.constant 0 : index
    %c0_7 = arith.constant 0 : index
    %6 = vector.load %arg1[%c0_6, %c0_7] : memref<32x256xbf16, #tpu.memory_space<vmem>>, vector<32x256xbf16>
    %cst = arith.constant dense<0.000000e+00> : vector<8x256xf32>
    %7 = tpu.matmul %5, %6, %cst {dimension_numbers = #tpu.dot_dimension_numbers<[1], [0], [0], [1], [0, 0, 1, 1], [], []>} : vector<8x32xbf16>, vector<32x256xbf16>, vector<8x256xf32> -> vector<8x256xf32>
    %8 = vector.broadcast %0 : vector<1x256xf32> to vector<8x256xf32>
    %9 = arith.addf %7, %8 : vector<8x256xf32>
    %cst_8 = arith.constant 0.000000e+00 : f32
    %10 = vector.broadcast %cst_8 : f32 to vector<8x256xf32>
    %11 = arith.maximumf %9, %10 : vector<8x256xf32>
    %12 = arith.truncf %11 : vector<8x256xf32> to vector<8x256xbf16>
    %c0_9 = arith.constant 0 : index
    %c0_10 = arith.constant 0 : index
    %13 = vector.load %arg2[%c0_9, %c0_10] : memref<256x128xbf16, #tpu.memory_space<vmem>>, vector<256x128xbf16>
    %cst_11 = arith.constant dense<0.000000e+00> : vector<8x128xf32>
    %14 = tpu.matmul %12, %13, %cst_11 {dimension_numbers = #tpu.dot_dimension_numbers<[1], [0], [0], [1], [0, 0, 1, 1], [], []>} : vector<8x256xbf16>, vector<256x128xbf16>, vector<8x128xf32> -> vector<8x128xf32>
    %15 = vector.broadcast %1 : vector<1x128xf32> to vector<8x128xf32>
    %16 = arith.addf %14, %15 : vector<8x128xf32>
    %cst_12 = arith.constant 0.000000e+00 : f32
    %17 = vector.broadcast %cst_12 : f32 to vector<8x128xf32>
    %18 = arith.maximumf %16, %17 : vector<8x128xf32>
    %19 = arith.truncf %18 : vector<8x128xf32> to vector<8x128xbf16>
    %c0_13 = arith.constant 0 : index
    %c0_14 = arith.constant 0 : index
    %20 = vector.load %arg3[%c0_13, %c0_14] : memref<128x64xbf16, #tpu.memory_space<vmem>>, vector<128x64xbf16>
    %cst_15 = arith.constant dense<0.000000e+00> : vector<8x64xf32>
    %21 = tpu.matmul %19, %20, %cst_15 {dimension_numbers = #tpu.dot_dimension_numbers<[1], [0], [0], [1], [0, 0, 1, 1], [], []>} : vector<8x128xbf16>, vector<128x64xbf16>, vector<8x64xf32> -> vector<8x64xf32>
    %22 = vector.broadcast %2 : vector<1x64xf32> to vector<8x64xf32>
    %23 = arith.addf %21, %22 : vector<8x64xf32>
    %cst_16 = arith.constant 0.000000e+00 : f32
    %24 = vector.broadcast %cst_16 : f32 to vector<8x64xf32>
    %25 = arith.maximumf %23, %24 : vector<8x64xf32>
    %26 = arith.truncf %25 : vector<8x64xf32> to vector<8x64xbf16>
    %c0_17 = arith.constant 0 : index
    %c0_18 = arith.constant 0 : index
    %27 = vector.load %arg4[%c0_17, %c0_18] : memref<64x128xbf16, #tpu.memory_space<vmem>>, vector<64x128xbf16>
    %cst_19 = arith.constant dense<0.000000e+00> : vector<8x128xf32>
    %28 = tpu.matmul %26, %27, %cst_19 {dimension_numbers = #tpu.dot_dimension_numbers<[1], [0], [0], [1], [0, 0, 1, 1], [], []>} : vector<8x64xbf16>, vector<64x128xbf16>, vector<8x128xf32> -> vector<8x128xf32>
    %29 = vector.broadcast %3 : vector<1x128xf32> to vector<8x128xf32>
    %30 = arith.addf %28, %29 : vector<8x128xf32>
    %31 = tpu.iota {dimensions = array<i32: 1>} : vector<8x128xi32>
    %32 = arith.negf %30 : vector<8x128xf32>
    %33 = math.exp %32 : vector<8x128xf32>
    %cst_20 = arith.constant 1.000000e+00 : f32
    %34 = vector.broadcast %cst_20 : f32 to vector<8x128xf32>
    %35 = arith.addf %34, %33 : vector<8x128xf32>
    %36 = arith.divf %34, %35 : vector<8x128xf32>
    %37 = math.tanh %30 : vector<8x128xf32>
    %c9_i32 = arith.constant 9 : i32
    %38 = vector.broadcast %c9_i32 : i32 to vector<8x128xi32>
    %39 = arith.cmpi eq, %31, %38 : vector<8x128xi32>
    %c10_i32 = arith.constant 10 : i32
    %40 = vector.broadcast %c10_i32 : i32 to vector<8x128xi32>
    %41 = arith.cmpi eq, %31, %40 : vector<8x128xi32>
    %42 = arith.select %41, %37, %30 : vector<8x128xi1>, vector<8x128xf32>
    %43 = arith.select %39, %36, %42 : vector<8x128xi1>, vector<8x128xf32>
    %c0_21 = arith.constant 0 : index
    %c0_22 = arith.constant 0 : index
    %44 = vector.load %arg6[%c0_21, %c0_22] : memref<8x128xf32, #tpu.memory_space<vmem>>, vector<8x128xf32>
    tpu.vector_store %arg6[%c0_21, %c0_22], %43 {strides = array<i32>} : memref<8x128xf32, #tpu.memory_space<vmem>>, vector<8x128xf32>,
    return
  }
}

</mosaic_0001>

<bundles_post_ra>
// kernel: tpu_custom_call.1
= control target key start
LH: loop header
LB: loop body
LE: loop exit
PB: predicated region body
PF: predicated region fallthrough
CT: control target
= control target key end

     0   :  { %11 = vsyncpa [#allocation3], 0  ;;  %s874_s0 = inlined_call_operand.vmem [shape: f32[8,32], index: 0, kind: input, shape index: {}]   ;;  %s875_s1 = inlined_call_operand.vmem [shape: bf16[32,256], index: 1, kind: input, shape index: {}]   ;;  %s876_s2 = inlined_call_operand.hbm [shape: bf16[256,128], index: 2, kind: input, shape index: {}]   ;;  %s877_s3 = inlined_call_operand.vmem [shape: bf16[128,64], index: 3, kind: input, shape index: {}]   ;;  %s878_s4 = inlined_call_operand.vmem [shape: bf16[64,128], index: 4, kind: input, shape index: {}]   ;;  %s879_s5 = inlined_call_operand.vmem [shape: f32[1,640], index: 5, kind: input, shape index: {}]   ;;  %s880_s6 = inlined_call_operand.hbm [shape: f32[8,128], index: 6, kind: output, shape index: {}]  }
   0x1   :  { %12 = vsyncpa [#allocation4], 0  ;;  %s729_s21 = smov [#allocation2]   ;;  %s681_s25 = scalar_lea.hbm %s876_s2, 2048 }
   0x2   :  { %s22_s22 = sshll.u32 %s729_s21, 4  ;;  %p682_p0 = scmp.ne.s32.totalorder %s876_s2, %s681_s25  ;;  %s23_s22 = int_to_ptr.vmem [resolvable:$true] %s22_s22 }
   0x3   :  { %p685_p1 = scmp.lt.u32.totalorder %s681_s25, %s876_s2 }
   0x5   :  { %p687_p2 = pnand %p685_p1, %p682_p0 }
   0x7   :  { %690 = shalt.err (!%p687_p2)
}
   0x8   :  { %s691_s30 = scalar_lea.vmem %s23_s22, 2048  ;;  %p696_p4 = scmp.lt.s32.totalorder %s23_s22, %s23_s22 }
   0x9   :  { %p692_p3 = scmp.ne.s32.totalorder %s23_s22, %s691_s30  ;;  %p697_p5 = scmp.lt.s32.totalorder %s691_s30, %s691_s30 }
   0xb   :  { %p698_p6 = por %p697_p5, %p696_p4 }
   0xd   :  { %p699_p7 = pnand %p698_p6, %p692_p3 }
   0xf   :  { %702 = shalt.err (!%p699_p7)
}
  0x10   :  { %s730_s7 = smov 64   ;;  %s731_s8 = smov 4  }
  0x11   :  { %28 = dma.hbm_to_vmem [thread:$0]  %s876_s2, 2048, %s23_s22, [#allocation3], %s730_s7, %s730_s7, %s731_s8  }
  0x12   :  { %725 = dma.done.wait [#allocation3], 2048  }
  0x13   :  { %726 = vsyncadd [#allocation3], 4294965248  ;;  %v732_v0 = vmov 0   ;;  %v641_v1 = vld [vmem:[%s875_s1 + $0x4] ss:$8 sps:$4 sm:$0xff]   ;;  %vm80_vm0 = vcmask 261120   ;;  %v50_v30 = vlaneseq }
  0x14   :  { %116 = vmatprep.mubr.bf16.mxu0 %v732_v0  ;;  %v643_v2 = vld [vmem:[%s875_s1] ss:$8 sps:$4 sm:$0xff]   ;;  %84 = vmatprep.subr.bf16.mxu0 %v641_v1  ;;  %v644_v3 = vld [vmem:[%s875_s1 + $0x14] ss:$8 sps:$4 sm:$0xff]   ;;  %v646_v4 = vld [vmem:[%s875_s1 + $0x10] ss:$8 sps:$4 sm:$0xff]  }
  0x15   :  { %v43_v5 = vld [vmem:[%s874_s0] sm:$0xff]  ;;  %85 = vmatpush1.bf16.msra.mxu0 %v643_v2  ;;  %v649_v8 = vld [vmem:[#allocation2 + $0x48] sm:$0xff]   ;;  %v651_v11 = vld [vmem:[#allocation2 + $0x50] sm:$0xff]   ;;  %v733_v24 = vmov 0.0   ;;  %v51_v31 = vshrl.u32 %v50_v30, 7  ;;  %vm734_vm1 = vmmov 0  }
  0x16   :  { %v647_v6 = vld [vmem:[#allocation2 + $0x40] sm:$0xff]   ;;  %86 = vmatprep.subr.bf16.mxu0 %v644_v3  ;;  %v44_v9 = vpack.c.bf16 %v43_v5, %v43_v5  ;;  %v650_v10 = vld [vmem:[#allocation2 + $0x8] sm:$0xff]   ;;  %v652_v12 = vld [vmem:[#allocation2 + $0x10] sm:$0xff]   ;;  %vm455_vm2 = vcmask 523264  }
  0x17   :  { %v648_v7 = vld [vmem:[#allocation2] sm:$0xff]   ;;  %566 = vmatprep.subr.bf16.mxu1 %v647_v6  ;;  %v653_v13 = vld [vmem:[#allocation2 + $0x58] sm:$0xff]   ;;  %v657_v17 = vld [vmem:[#allocation2 + $0x68] sm:$0xff]   ;;  %v52_v32 = vsub.s32 0, %v51_v31  ;;  %v56_v34 = vsub.s32 1, %v51_v31 }
  0x18   :  { %567 = vmatpush3.bf16.msra.mxu1 %v648_v7  ;;  %v654_v14 = vld [vmem:[#allocation2 + $0x18] sm:$0xff]   ;;  %v655_v15 = vld [vmem:[#allocation2 + $0x60] sm:$0xff]   ;;  %v658_v18 = vld [vmem:[#allocation2 + $0x28] sm:$0xff]  }
  0x19   :  { %87 = vmatpush1.bf16.msra.mxu0 %v646_v4  ;;  %568 = vmatprep.subr.bf16.mxu1 %v649_v8  ;;  %v656_v16 = vld [vmem:[#allocation2 + $0x20] sm:$0xff]   ;;  %v659_v19 = vld [vmem:[#allocation2 + $0x70] sm:$0xff]   ;;  %v661_v21 = vld [vmem:[#allocation2 + $0x78] sm:$0xff]  }
  0x1a   :  { %v660_v20 = vld [vmem:[#allocation2 + $0x30] sm:$0xff]   ;;  %v662_v22 = vld [vmem:[#allocation2 + $0x38] sm:$0xff]   ;;  %v663_v23 = vld [vmem:[%s877_s3] sm:$0xff]   ;;  %602 = vmatprep.subr.bf16.mxu0 %v733_v24 }
  0x1b   :  { %v664_v25 = vld [vmem:[%s877_s3 + $0x8] sm:$0xff]   ;;  %v665_v26 = vld [vmem:[%s877_s3 + $0x10] sm:$0xff]   ;;  %v666_v27 = vld [vmem:[%s877_s3 + $0x18] sm:$0xff]  }
  0x1c   :  { %532 = vmatmul.mubr.msk.bf16.vlgmr.msra.gmra.mrb[0].mxu0 %vm80_vm0, %v44_v9  ;;  %569 = vmatpush3.bf16.msra.mxu1 %v650_v10  ;;  %v667_v28 = vld [vmem:[%s877_s3 + $0x20] sm:$0xff]   ;;  %v668_v29 = vld [vmem:[%s877_s3 + $0x28] sm:$0xff]   ;;  %v669_v47 = vld [vmem:[%s877_s3 + $0x30] sm:$0xff]  }
  0x1d   :  { %570 = vmatprep.subr.bf16.mxu1 %v651_v11  ;;  %603 = vmatpush3.bf16.msra.mxu0 %v663_v23  ;;  %v39_v33 = vld [vmem:[%s879_s5] sm:$0x3]  ;;  %v670_v48 = vld [vmem:[%s877_s3 + $0x38] sm:$0xff]   ;;  %v672_v50 = vld [vmem:[%s878_s4 + $0x8] sm:$0xff]  }
  0x1e   :  { %604 = vmatprep.subr.bf16.mxu0 %v733_v24  ;;  %v53_v35 = vrot.slane %v39_v33, %v52_v32  ;;  %v57_v36 = vrot.slane %v39_v33, %v56_v34  ;;  %618 = vmatprep.mubr.msk.bf16.mxu0 %vm734_vm1, %v733_v24  ;;  %v671_v49 = vld [vmem:[%s878_s4] sm:$0xff]   ;;  %v673_v60 = vld [vmem:[%s878_s4 + $0x10] sm:$0xff]   ;;  %v674_v61 = vld [vmem:[%s878_s4 + $0x18] sm:$0xff]   ;;  %s735_s4 = smov [#allocation5]  }
  0x1f   :  { %v533_v52 = vld [vmem:[%s879_s5 + $0x2] ss:$0 sm:$0xff]  ;;  %v550_v62 = vld [vmem:[%s879_s5 + $0x3] ss:$0 sm:$0xff]  ;;  %v559_v6 = vld [vmem:[%s879_s5 + $0x4] ss:$0 sm:$0xff] }
  0x20   :  { %571 = vmatpush3.bf16.msra.mxu1 %v652_v12  ;;  %s519_s22 = sshll.u32 %s735_s4, 4  ;;  %s520_s22 = int_to_ptr.vmem [resolvable:$true] %s519_s22 }
  0x21   :  { %572 = vmatprep.subr.bf16.mxu1 %v653_v13  ;;  %605 = vmatpush3.bf16.msra.mxu0 %v664_v25  ;;  %s703_s5 = scalar_lea.vmem %s520_s22, 128  ;;  %p708_p9 = scmp.lt.s32.totalorder %s520_s22, %s520_s22 }
  0x22   :  { %606 = vmatprep.subr.bf16.mxu0 %v733_v24  ;;  %p704_p8 = scmp.ne.s32.totalorder %s520_s22, %s703_s5  ;;  %p709_p10 = scmp.lt.s32.totalorder %s703_s5, %s703_s5 }
  0x24   :  { %573 = vmatpush3.bf16.msra.mxu1 %v654_v14  ;;  %p710_p11 = por %p709_p10, %p708_p9 }
  0x25   :  { %574 = vmatprep.subr.bf16.mxu1 %v655_v15  ;;  %607 = vmatpush3.bf16.msra.mxu0 %v665_v26  ;;  %v500_v15 = vand.u32 127, %v50_v30 }
  0x26   :  { %608 = vmatprep.subr.bf16.mxu0 %v733_v24  ;;  %p711_p12 = pnand %p710_p11, %p704_p8 }
  0x27   :  { %vm509_vm3 = vcmp.eq.s32.totalorder %v500_v15, 10  ;;  %vm508_vm4 = vcmp.eq.s32.totalorder %v500_v15, 9 }
  0x28   :  { %575 = vmatpush3.bf16.msra.mxu1 %v656_v16 }
  0x29   :  { %576 = vmatprep.subr.bf16.mxu1 %v657_v17  ;;  %609 = vmatpush3.bf16.msra.mxu0 %v666_v27 }
  0x2a   :  { %610 = vmatprep.subr.bf16.mxu0 %v733_v24 }
  0x2c   :  { %577 = vmatpush3.bf16.msra.mxu1 %v658_v18 }
  0x2d   :  { %578 = vmatprep.subr.bf16.mxu1 %v659_v19  ;;  %611 = vmatpush3.bf16.msra.mxu0 %v667_v28 }
  0x2e   :  { %612 = vmatprep.subr.bf16.mxu0 %v733_v24 }
  0x30   :  { %579 = vmatpush3.bf16.msra.mxu1 %v660_v20 }
  0x31   :  { %580 = vmatprep.subr.bf16.mxu1 %v661_v21  ;;  %613 = vmatpush3.bf16.msra.mxu0 %v668_v29 }
  0x32   :  { %614 = vmatprep.subr.bf16.mxu0 %v733_v24 }
  0x34   :  { %581 = vmatpush3.bf16.msra.mxu1 %v662_v22 }
  0x35   :  { %622 = vmatprep.subr.bf16.mxu1 %v733_v24  ;;  %615 = vmatpush3.bf16.msra.mxu0 %v669_v47 }
  0x36   :  { %616 = vmatprep.subr.bf16.mxu0 %v733_v24 }
  0x39   :  { %617 = vmatpush3.bf16.msra.mxu0 %v670_v48 }
  0xef   :  { %v118_v37 = vpop.f32.mrb[0].mxu0 }
  0xf0   :  { %v119_v38 = vadd.f32 %v118_v37, %v53_v35  ;;  %v120_v39 = vpop.f32.mrb[1].mxu0 }
  0xf1   :  { %v121_v40 = vadd.f32 %v120_v39, %v57_v36  ;;  %v122_v41 = vpop.f32.mrb[2].mxu0 }
  0xf2   :  { %v125_v42 = vmax.f32 %v119_v38, 0.0  ;;  %v123_v43 = vpop.f32.mrb[3].mxu0 }
  0xf3   :  { %v126_v44 = vmax.f32 %v121_v40, 0.0 }
  0xf4   :  { %v127_v46 = vpack.c.bf16 %v125_v42, %v125_v42 }
  0xf5   :  { %v128_v45 = vpack.c.bf16 %v126_v44, %v126_v44 }
  0xf7   :  { %295 = vmatprep.mubr.bf16.mxu1 %v128_v45 }
  0xf8   :  { %296 = vmatmul.mubr.bf16.vlgmr.msra.gmra.mrb[0].mxu1 %v127_v46 }
  0xf9   :  { %630 = vmatprep.mubr.msk.bf16.mxu1 %vm734_vm1, %v733_v24  ;;  %623 = vmatpush3.bf16.msra.mxu1 %v671_v49 }
  0xfa   :  { %624 = vmatprep.subr.bf16.mxu1 %v733_v24 }
  0xfd   :  { %625 = vmatpush3.bf16.msra.mxu1 %v672_v50 }
  0xfe   :  { %626 = vmatprep.subr.bf16.mxu1 %v733_v24 }
 0x101   :  { %627 = vmatpush3.bf16.msra.mxu1 %v673_v60 }
 0x102   :  { %628 = vmatprep.subr.bf16.mxu1 %v733_v24 }
 0x105   :  { %629 = vmatpush3.bf16.msra.mxu1 %v674_v61 }
 0x1cb   :  { %v582_v51 = vpop.f32.mrb[0].mxu1 }
 0x1cc   :  { %v583_v53 = vpop.f32.mrb[1].mxu1 }
 0x1cd   :  { %v584_v54 = vadd.f32 %v583_v53, %v582_v51  ;;  %v585_v55 = vpop.f32.mrb[2].mxu1 }
 0x1ce   :  { %v586_v56 = vpop.f32.mrb[3].mxu1 }
 0x1cf   :  { %v298_v57 = vadd.f32 %v584_v54, %v533_v52 }
 0x1d1   :  { %v303_v58 = vmax.f32 %v298_v57, 0.0 }
 0x1d3   :  { %v304_v59 = vpack.c.bf16 %v303_v58, %v303_v58 }
 0x1d5   :  { %619 = vmatmul.mubr.bf16.vlgmr.msra.gmra.mrb[4].mxu0 %v304_v59 }
 0x2a8   :  { %v409_v63 = vpop.f32.mrb[4].mxu0 }
 0x2a9   :  { %v410_v0 = vadd.f32 %v550_v62, %v409_v63  ;;  %v620_v1 = vpop.f32.mrb[5].mxu0 }
 0x2aa   :  { %v412_v2 = vpop.f32.mrb[6].mxu0 }
 0x2ab   :  { %v415_v3 = vmax.f32 %v410_v0, 0.0  ;;  %v621_v4 = vpop.f32.mrb[7].mxu0 }
 0x2ad   :  { %v416_v5 = vpack.c.bf16 %v415_v3, %v415_v3 }
 0x2af   :  { %631 = vmatmul.mubr.msk.bf16.vlgmr.msra.gmra.mrb[4].mxu1 %vm455_vm2, %v416_v5 }
 0x382   :  { %v493_v7 = vpop.f32.mrb[4].mxu1 }
 0x383   :  { %v494_v8 = vadd.f32 %v559_v6, %v493_v7  ;;  %v632_v9 = vpop.f32.mrb[5].mxu1 }
 0x384   :  { %v496_v10 = vpop.f32.mrb[6].mxu1 }
 0x385   :  { %v565_v11 = vmul.f32 -1.442695, %v494_v8  ;;  %v633_v12 = vpop.f32.mrb[7].mxu1 }
 0x387   :  { %675 = vpow2.f32 %v565_v11 }
 0x388   :  { %677 = vtanh.f32 %v494_v8 }
 0x391   :  { %v676_v13 = vpop.eup %675 }
 0x392   :  { %v504_v14 = vadd.f32 1.0, %v676_v13  ;;  %v678_v16 = vpop.eup %677 }
 0x393   :  { %v510_v18 = vsel %vm509_vm3, %v678_v16, %v494_v8 }
 0x394   :  { %679 = vrcp.f32 %v504_v14 }
 0x39e   :  { %v680_v17 = vpop.eup %679 }
 0x39f   :  { %v511_v19 = vsel %vm508_vm4, %v680_v17, %v510_v18 }
 0x3a0   :  { %512 = vst [vmem:[#allocation5] sm:$0xff] %v511_v19 }
 0x3a1   :  { %714 = shalt.err (!%p711_p12)
}
 0x3a2   :  { %s715_s25 = scalar_lea.hbm %s880_s6, 128 }
 0x3a3   :  { %p716_p13 = scmp.ne.s32.totalorder %s880_s6, %s715_s25  ;;  %p719_p0 = scmp.lt.u32.totalorder %s715_s25, %s880_s6 }
 0x3a5   :  { %p721_p1 = pnand %p719_p0, %p716_p13 }
 0x3a7   :  { %724 = shalt.err (!%p721_p1)
}
 0x3a8   :  { %522 = dma.vmem_to_hbm [thread:$0]  %s520_s22, 128, %s880_s6, [#allocation4]  }
 0x3a9   :  { %727 = dma.done.wait [#allocation4], 128  }
 0x3aa   :  { %728 = vsyncadd [#allocation4], 4294967168 }
 0x3ab   :  { %526 = vsyncpa [#allocation3], 1 }
 0x3ac   :  { %527 = vsyncpa [#allocation4], 1 }

</bundles_post_ra>
